<compile_context>
chip_gen: v7x
topology: tpu7x:2x2x1
jax: 0.10.0
libtpu: 0.0.40
codegen_flags: <defaults>
</compile_context>

<pallas_src>
import functools

import jax
import jax.numpy as jnp
from jax import lax
from jax.experimental import pallas as pl
from jax.experimental.pallas import tpu as pltpu


_S = 128  # points packed per lane-row; data-row lane width is _S * C (multiple of 128)


def _round_up(x, m):
    return ((x + m - 1) // m) * m


def _num_tensorcores():
    """Best-effort TensorCore count behind one XLA device (megacore/v7x -> 2)."""
    try:
        kind = jax.devices()[0].device_kind.lower()
    except Exception:
        return 1
    # Single-TensorCore-per-device generations: v2/v3, v5e, v6e ("lite" parts).
    if any(t in kind for t in ("v2", "v3", "lite", "v5e", "v6e")):
        return 1
    # v4 / v5p megacore and v7x expose 2 TensorCores behind one device.
    return 2


def _vmem_capacity_bytes():
    try:
        return int(pltpu.get_tpu_info().vmem_capacity_bytes)
    except Exception:
        return 64 * 1024 * 1024  # conservative fallback (v7x physical VMEM)


def _plan_tiles(B, rows, C, x_bytes, cf_bytes, n_cores, vmem_budget, target_block):
    """Pick (n_chunks, steps, T): T rows (of _S points each) per grid step."""
    if rows < 16:
        return 1, 1, rows                       # single full-extent block
    data_row = B * _S * C * x_bytes             # one row of one data input block
    conf_row = B * _S * cf_bytes
    tmp_row = 3 * B * _S * C * 4                # in-kernel f32/bf16 temporaries
    per_row = 2 * 2 * data_row + 2 * conf_row + tmp_row
    t_des = max(16, min(vmem_budget // per_row, target_block // data_row) // 16 * 16)

    n_chunks = n_cores if (n_cores > 1 and rows >= 32) else 1
    share = -(-rows // n_chunks)                # never idle a core for mid-size N
    T = max(16, min(t_des, share // 16 * 16))
    n_blocks = -(-rows // T)
    steps = -(-n_blocks // n_chunks)
    # Rebalance: largest 16-multiple tile that still covers rows on this grid.
    T = max(16, min(rows // 16 * 16, _round_up(-(-rows // (n_chunks * steps)), 16)))
    return n_chunks, steps, T


def _make_vect_loss_kernel(B, T, C, rows, steps, type_l, has_conf, use_matmul,
                           needs_mask, batched):
    """Grid = (chunk, step); the (1, B, lanes) output block is the lane-wide
    accumulator, resident across the inner ("arbitrary") axis."""
    S = _S
    TF = S * C

    def kernel(*refs):
        it = iter(refs)
        x_ref = next(it)
        g_ref = next(it)
        sel_ref = next(it) if use_matmul else None
        cf_ref = next(it) if has_conf else None
        out_ref = next(it)

        c = pl.program_id(0)
        s = pl.program_id(1)

        @pl.when(s == 0)
        def _init():
            out_ref[...] = jnp.zeros_like(out_ref)

        x = x_ref[...].astype(jnp.float32)            # (B, T, S*C)
        g = g_ref[...].astype(jnp.float32)
        d = x - g
        val = d * d if type_l == "L2" else jnp.abs(d)

        start = (c * steps + s) * T                   # first (unclamped) row of this step

        if not use_matmul:
            # L1 without confidence: the per-point C-group sum commutes with the
            # row/lane reductions, so accumulate a lane-wide (B, S*C) partial.
            if needs_mask:
                ok = (lax.broadcasted_iota(jnp.int32, (1, T, 1), 1) + start) < rows
                val = jnp.where(ok, val, 0.0)
            out_ref[...] += jnp.sum(val, axis=1)[None]
            return

        sel = sel_ref[...]                            # (S*C, S) bf16, exact 0/1

        def group_sum(mat):                           # (R, S*C) f32 -> (R, S) f32
            # 2-way exact-ish split (hi/mid ~ 16 mantissa bits, rel err ~2^-17);
            # MXU bf16 matmuls with f32 accumulation against a 0/1 selector.
            hi = mat.astype(jnp.bfloat16)
            mid = (mat - hi.astype(jnp.float32)).astype(jnp.bfloat16)
            return (jnp.dot(hi, sel, preferred_element_type=jnp.float32)
                    + jnp.dot(mid, sel, preferred_element_type=jnp.float32))

        if has_conf:
            cf = cf_ref[...].astype(jnp.float32)      # (B, T, S)

        if batched:
            # Tile-aligned collapse of the batch into the sublane dim: one MXU
            # push/pop sequence for the whole block instead of per-batch loops.
            pp = group_sum(val.reshape(B * T, TF)).reshape(B, T, S)
            if type_l == "L2":
                pp = jnp.sqrt(pp)
            if has_conf:
                pp = pp * cf
            if needs_mask:
                ok = (lax.broadcasted_iota(jnp.int32, (1, T, 1), 1) + start) < rows
                pp = jnp.where(ok, pp, 0.0)
            out_ref[...] += jnp.sum(pp, axis=1)[None]
        else:
            # Tiny / sublane-unaligned tile (rows < 16): per-batch matmuls.
            parts = []
            for b in range(B):
                pp_b = group_sum(val[b])              # (T, S)
                if type_l == "L2":
                    pp_b = jnp.sqrt(pp_b)
                if has_conf:
                    pp_b = pp_b * cf[b]
                if needs_mask:
                    ok = (lax.broadcasted_iota(jnp.int32, (T, 1), 0) + start) < rows
                    pp_b = jnp.where(ok, pp_b, 0.0)
                parts.append(jnp.sum(pp_b, axis=0, keepdims=True))    # (1, S)
            step_sum = jnp.concatenate(parts, axis=0) if B > 1 else parts[0]
            out_ref[...] += step_sum[None]

    return kernel


@functools.partial(jax.jit, static_argnames=("type_l",))
def vect_loss(vect, vect_gt, confidence=None, *, type_l="L2"):
    """Pallas implementation of VECTLoss.forward (non-multi-head, no self_su)."""
    B, N, C = vect.shape
    assert vect_gt.shape == (B, N, C)
    has_conf = confidence is not None
    S = _S

    conf2d = confidence.reshape(B, N) if has_conf else None   # native dtype, no upcast

    # Ragged tail (N % 128 != 0): pad only to the next full 128-point row.
    N_pad = _round_up(N, S)
    if N_pad != N:
        pad = N_pad - N
        vect = jnp.pad(vect, ((0, 0), (0, pad), (0, 0)))
        vect_gt = jnp.pad(vect_gt, ((0, 0), (0, pad), (0, 0)))
        if has_conf:
            conf2d = jnp.pad(conf2d, ((0, 0), (0, pad)))
    rows = N_pad // S

    # Free, contiguity-preserving reshapes to the lane-dense layout.
    x3 = vect.reshape(B, rows, S * C)
    g3 = vect_gt.reshape(B, rows, S * C)
    cf3 = conf2d.reshape(B, rows, S) if has_conf else None

    use_matmul = not (type_l == "L1" and not has_conf)

    n_cores = _num_tensorcores()
    vmem_cap = _vmem_capacity_bytes()
    vmem_limit = max(32 * 1024 * 1024, int(vmem_cap * 0.7))
    n_chunks, steps, T = _plan_tiles(
        B, rows, C,
        x_bytes=jnp.dtype(vect.dtype).itemsize,
        cf_bytes=jnp.dtype(conf2d.dtype).itemsize if has_conf else 0,
        n_cores=n_cores,
        vmem_budget=vmem_limit // 2,
        target_block=4 * 1024 * 1024,
    )
    n_blocks = -(-rows // T)
    needs_mask = (n_chunks * steps * T != rows)   # grid over-covers -> mask in-kernel
    batched = (T % 8 == 0)                        # safe cross-batch sublane collapse

    def data_map(c, s):
        # Clamp so no visited block starts out of bounds; the over-coverage
        # steps are fully masked to zero inside the kernel.
        return (0, jnp.minimum(c * steps + s, n_blocks - 1), 0)

    inputs = [x3, g3]
    in_specs = [
        pl.BlockSpec((B, T, S * C), data_map),
        pl.BlockSpec((B, T, S * C), data_map),
    ]
    if use_matmul:
        # Block-diagonal group-sum selector: sel[k, p] = 1 iff k // C == p.
        # Constant input, block index never changes -> fetched once, no rebuild.
        sel = (jnp.arange(S * C)[:, None] // C == jnp.arange(S)[None, :]
               ).astype(jnp.bfloat16)
        inputs.append(sel)
        in_specs.append(pl.BlockSpec((S * C, S), lambda c, s: (0, 0)))
    if has_conf:
        inputs.append(cf3)
        in_specs.append(pl.BlockSpec((B, T, S), data_map))

    out_lanes = S if use_matmul else S * C
    kernel = _make_vect_loss_kernel(B, T, C, rows, steps, type_l, has_conf,
                                    use_matmul, needs_mask, batched)

    partials = pl.pallas_call(
        kernel,
        out_shape=jax.ShapeDtypeStruct((n_chunks, B, out_lanes), jnp.float32),
        grid_spec=pltpu.PrefetchScalarGridSpec(
            num_scalar_prefetch=0,
            grid=(n_chunks, steps),
            in_specs=in_specs,
            out_specs=pl.BlockSpec((1, B, out_lanes), lambda c, s: (c, 0, 0)),
        ),
        compiler_params=pltpu.CompilerParams(
            dimension_semantics=("parallel", "arbitrary"),
            vmem_limit_bytes=vmem_limit,
        ),
    )(*inputs)

    # Final tiny reduction + mean scaling (true N; padded/masked rows contributed 0).
    return partials.sum(axis=(0, 2)) * (1.0 / N)


def vect_loss_ref(vect, vect_gt, confidence=None, type_l="L2"):
    """Pure-JAX reference matching the PyTorch forward (non-multi-head)."""
    diff = vect.astype(jnp.float32) - vect_gt.astype(jnp.float32)
    if type_l == "L2":
        d = jnp.sqrt(jnp.sum(diff * diff, axis=2))
    else:
        d = jnp.sum(jnp.abs(diff), axis=2)
    if confidence is not None:
        d = d * confidence.reshape(d.shape).astype(jnp.float32)
    return jnp.mean(d, axis=1)


if __name__ == "__main__":
    key = jax.random.PRNGKey(0)
    k1, k2, k3, k4, k5 = jax.random.split(key, 5)

    # Case 1: default config (TYPE_L='L2', no confidence), 3-D vectors.
    B, N, C = 2, 640, 3
    vect = jax.random.normal(k1, (B, N, C), dtype=jnp.float32)
    vect_gt = jax.random.normal(k2, (B, N, C), dtype=jnp.float32)
    out_l2 = jax.block_until_ready(vect_loss(vect, vect_gt, type_l="L2"))
    ref_l2 = vect_loss_ref(vect, vect_gt, type_l="L2")
    assert out_l2.shape == (B,)
    assert jnp.allclose(out_l2, ref_l2, atol=1e-5, rtol=1e-4)

    # Case 2: L1 with confidence, C=2, N not a multiple of 128 (tail-pad path).
    B2, N2, C2 = 2, 200, 2
    v2 = jax.random.normal(k3, (B2, N2, C2), dtype=jnp.float32)
    g2 = jax.random.normal(k4, (B2, N2, C2), dtype=jnp.float32)
    conf2 = jax.nn.sigmoid(jax.random.normal(k5, (B2, N2), dtype=jnp.float32))
    out_l1 = jax.block_until_ready(vect_loss(v2, g2, conf2, type_l="L1"))
    ref_l1 = vect_loss_ref(v2, g2, conf2, type_l="L1")
    assert jnp.allclose(out_l1, ref_l1, atol=1e-5, rtol=1e-4)

    # Case 2b: L1 without confidence (pure-VPU lane-wide accumulation path).
    out_l1b = jax.block_until_ready(vect_loss(v2, g2, type_l="L1"))
    ref_l1b = vect_loss_ref(v2, g2, type_l="L1")
    assert jnp.allclose(out_l1b, ref_l1b, atol=1e-5, rtol=1e-4)

    # Case 3: C == 1 (module's squeeze branch), L2 with confidence.
    v3 = jax.random.normal(k1, (2, 256, 1), dtype=jnp.float32)
    g3 = jax.random.normal(k2, (2, 256, 1), dtype=jnp.float32)
    c3 = jax.nn.sigmoid(jax.random.normal(k3, (2, 256), dtype=jnp.float32))
    out_c1 = jax.block_until_ready(vect_loss(v3, g3, c3, type_l="L2"))
    ref_c1 = vect_loss_ref(v3, g3, c3, type_l="L2")
    assert jnp.allclose(out_c1, ref_c1, atol=1e-5, rtol=1e-4)

    # Case 4: larger, unaligned N to exercise the batched matmul, multi-step
    # grid, in-kernel row masking, and (on multi-TC parts) the 2-chunk split.
    B4, N4, C4 = 2, 4196, 3
    v4 = jax.random.normal(k4, (B4, N4, C4), dtype=jnp.float32)
    g4 = jax.random.normal(k5, (B4, N4, C4), dtype=jnp.float32)
    c4 = jax.nn.sigmoid(jax.random.normal(k1, (B4, N4), dtype=jnp.float32))
    out_4 = jax.block_until_ready(vect_loss(v4, g4, c4, type_l="L2"))
    ref_4 = vect_loss_ref(v4, g4, c4, type_l="L2")
    assert jnp.allclose(out_4, ref_4, atol=1e-5, rtol=1e-4)

    print("KERNEL_OK")
</pallas_src>

<mosaic_0001>
module attributes {stable_mosaic.version = 11 : i64} {
  func.func @kernel(%arg0: i32, %arg1: i32, %arg2: memref<2x5x384xf32, #tpu.memory_space<vmem>>, %arg3: memref<2x5x384xf32, #tpu.memory_space<vmem>>, %arg4: memref<384x128xbf16, #tpu.memory_space<vmem>>, %arg5: memref<1x2x128xf32, #tpu.memory_space<vmem>>) attributes {dimension_semantics = [#tpu.dimension_semantics<parallel>, #tpu.dimension_semantics<arbitrary>], iteration_bounds = array<i64: 1, 1>, scalar_prefetch = 0 : i64, scratch_operands = 0 : i64, tpu.core_type = #tpu.core_type<tc>, window_params = [{transform_indices = @transform_0, window_bounds = array<i64: 2, 5, 384>}, {transform_indices = @transform_1, window_bounds = array<i64: 2, 5, 384>}, {pipeline_mode = #tpu.pipeline_mode<synchronous>, transform_indices = @transform_2, window_bounds = array<i64: 384, 128>}, {transform_indices = @transform_3, window_bounds = array<i64: 1, 2, 128>}]} {
    %c0_i32 = arith.constant 0 : i32
    %0 = arith.cmpi eq, %arg1, %c0_i32 : i32
    %1 = arith.extui %0 : i1 to i32
    %c0_i32_0 = arith.constant 0 : i32
    %2 = arith.cmpi ne, %1, %c0_i32_0 : i32
    scf.if %2 {
      %cst_19 = arith.constant 0.000000e+00 : f32
      %37 = vector.broadcast %cst_19 : f32 to vector<1x2x128xf32>
      %c0_20 = arith.constant 0 : index
      %c0_21 = arith.constant 0 : index
      %c0_22 = arith.constant 0 : index
      %38 = vector.load %arg5[%c0_20, %c0_21, %c0_22] : memref<1x2x128xf32, #tpu.memory_space<vmem>>, vector<1x2x128xf32>
      tpu.vector_store %arg5[%c0_20, %c0_21, %c0_22], %37 {strides = array<i32>} : memref<1x2x128xf32, #tpu.memory_space<vmem>>, vector<1x2x128xf32>,
    } else {
    }
    %c0 = arith.constant 0 : index
    %c0_1 = arith.constant 0 : index
    %c0_2 = arith.constant 0 : index
    %3 = vector.load %arg2[%c0, %c0_1, %c0_2] : memref<2x5x384xf32, #tpu.memory_space<vmem>>, vector<2x5x384xf32>
    %c0_3 = arith.constant 0 : index
    %c0_4 = arith.constant 0 : index
    %c0_5 = arith.constant 0 : index
    %4 = vector.load %arg3[%c0_3, %c0_4, %c0_5] : memref<2x5x384xf32, #tpu.memory_space<vmem>>, vector<2x5x384xf32>
    %5 = arith.subf %3, %4 : vector<2x5x384xf32>
    %6 = arith.mulf %5, %5 : vector<2x5x384xf32>
    %c0_6 = arith.constant 0 : index
    %c0_7 = arith.constant 0 : index
    %7 = vector.load %arg4[%c0_6, %c0_7] : memref<384x128xbf16, #tpu.memory_space<vmem>>, vector<384x128xbf16>
    %8 = vector.extract_strided_slice %6 {offsets = [0, 0, 0], sizes = [1, 5, 384], strides = [1, 1, 1]} : vector<2x5x384xf32> to vector<1x5x384xf32>
    %9 = vector.shape_cast %8 : vector<1x5x384xf32> to vector<5x384xf32>
    %10 = arith.truncf %9 : vector<5x384xf32> to vector<5x384xbf16>
    %11 = arith.extf %10 : vector<5x384xbf16> to vector<5x384xf32>
    %12 = arith.subf %9, %11 : vector<5x384xf32>
    %13 = arith.truncf %12 : vector<5x384xf32> to vector<5x384xbf16>
    %cst = arith.constant dense<0.000000e+00> : vector<5x128xf32>
    %14 = tpu.matmul %10, %7, %cst {dimension_numbers = #tpu.dot_dimension_numbers<[1], [0], [0], [1], [0, 0, 1, 1], [], []>} : vector<5x384xbf16>, vector<384x128xbf16>, vector<5x128xf32> -> vector<5x128xf32>
    %cst_8 = arith.constant dense<0.000000e+00> : vector<5x128xf32>
    %15 = tpu.matmul %13, %7, %cst_8 {dimension_numbers = #tpu.dot_dimension_numbers<[1], [0], [0], [1], [0, 0, 1, 1], [], []>} : vector<5x384xbf16>, vector<384x128xbf16>, vector<5x128xf32> -> vector<5x128xf32>
    %16 = arith.addf %14, %15 : vector<5x128xf32>
    %17 = math.sqrt %16 : vector<5x128xf32>
    %cst_9 = arith.constant dense<0.000000e+00> : vector<128xf32>
    %18 = vector.multi_reduction <add>, %17, %cst_9 [0] : vector<5x128xf32> to vector<128xf32>
    %19 = vector.shape_cast %18 : vector<128xf32> to vector<1x128xf32>
    %20 = vector.extract_strided_slice %6 {offsets = [1, 0, 0], sizes = [1, 5, 384], strides = [1, 1, 1]} : vector<2x5x384xf32> to vector<1x5x384xf32>
    %21 = vector.shape_cast %20 : vector<1x5x384xf32> to vector<5x384xf32>
    %22 = arith.truncf %21 : vector<5x384xf32> to vector<5x384xbf16>
    %23 = arith.extf %22 : vector<5x384xbf16> to vector<5x384xf32>
    %24 = arith.subf %21, %23 : vector<5x384xf32>
    %25 = arith.truncf %24 : vector<5x384xf32> to vector<5x384xbf16>
    %cst_10 = arith.constant dense<0.000000e+00> : vector<5x128xf32>
    %26 = tpu.matmul %22, %7, %cst_10 {dimension_numbers = #tpu.dot_dimension_numbers<[1], [0], [0], [1], [0, 0, 1, 1], [], []>} : vector<5x384xbf16>, vector<384x128xbf16>, vector<5x128xf32> -> vector<5x128xf32>
    %cst_11 = arith.constant dense<0.000000e+00> : vector<5x128xf32>
    %27 = tpu.matmul %25, %7, %cst_11 {dimension_numbers = #tpu.dot_dimension_numbers<[1], [0], [0], [1], [0, 0, 1, 1], [], []>} : vector<5x384xbf16>, vector<384x128xbf16>, vector<5x128xf32> -> vector<5x128xf32>
    %28 = arith.addf %26, %27 : vector<5x128xf32>
    %29 = math.sqrt %28 : vector<5x128xf32>
    %cst_12 = arith.constant dense<0.000000e+00> : vector<128xf32>
    %30 = vector.multi_reduction <add>, %29, %cst_12 [0] : vector<5x128xf32> to vector<128xf32>
    %31 = vector.shape_cast %30 : vector<128xf32> to vector<1x128xf32>
    %32 = tpu.concatenate %19, %31 in 0 : vector<1x128xf32>, vector<1x128xf32> -> vector<2x128xf32>
    %c0_13 = arith.constant 0 : index
    %c0_14 = arith.constant 0 : index
    %c0_15 = arith.constant 0 : index
    %33 = vector.load %arg5[%c0_13, %c0_14, %c0_15] : memref<1x2x128xf32, #tpu.memory_space<vmem>>, vector<1x2x128xf32>
    %34 = vector.shape_cast %32 : vector<2x128xf32> to vector<1x2x128xf32>
    %35 = arith.addf %33, %34 : vector<1x2x128xf32>
    %c0_16 = arith.constant 0 : index
    %c0_17 = arith.constant 0 : index
    %c0_18 = arith.constant 0 : index
    %36 = vector.load %arg5[%c0_16, %c0_17, %c0_18] : memref<1x2x128xf32, #tpu.memory_space<vmem>>, vector<1x2x128xf32>
    tpu.vector_store %arg5[%c0_16, %c0_17, %c0_18], %35 {strides = array<i32>} : memref<1x2x128xf32, #tpu.memory_space<vmem>>, vector<1x2x128xf32>,
    return
  }
  func.func @transform_0(%arg0: i32, %arg1: i32) -> (i32, i32, i32) {
    %c1_i32 = arith.constant 1 : i32
    %0 = arith.muli %arg0, %c1_i32 : i32
    %1 = arith.addi %0, %arg1 : i32
    %c0_i32 = arith.constant 0 : i32
    %2 = arith.minsi %1, %c0_i32 : i32
    %c0_i32_0 = arith.constant 0 : i32
    %c0_i32_1 = arith.constant 0 : i32
    %c0_i32_2 = arith.constant 0 : i32
    return %c0_i32_0, %2, %c0_i32_1 : i32, i32, i32
  }
  func.func @transform_1(%arg0: i32, %arg1: i32) -> (i32, i32, i32) {
    %c1_i32 = arith.constant 1 : i32
    %0 = arith.muli %arg0, %c1_i32 : i32
    %1 = arith.addi %0, %arg1 : i32
    %c0_i32 = arith.constant 0 : i32
    %2 = arith.minsi %1, %c0_i32 : i32
    %c0_i32_0 = arith.constant 0 : i32
    %c0_i32_1 = arith.constant 0 : i32
    %c0_i32_2 = arith.constant 0 : i32
    return %c0_i32_0, %2, %c0_i32_1 : i32, i32, i32
  }
  func.func @transform_2(%arg0: i32, %arg1: i32) -> (i32, i32) {
    %c0_i32 = arith.constant 0 : i32
    %c0_i32_0 = arith.constant 0 : i32
    %c0_i32_1 = arith.constant 0 : i32
    return %c0_i32, %c0_i32_0 : i32, i32
  }
  func.func @transform_3(%arg0: i32, %arg1: i32) -> (i32, i32, i32) {
    %c0_i32 = arith.constant 0 : i32
    %c0_i32_0 = arith.constant 0 : i32
    %c0_i32_1 = arith.constant 0 : i32
    return %arg0, %c0_i32, %c0_i32_0 : i32, i32, i32
  }
}

</mosaic_0001>

<bundles_post_ra>
// kernel: vect_loss.1
= control target key start
LH: loop header
LB: loop body
LE: loop exit
PB: predicated region body
PF: predicated region fallthrough
CT: control target
= control target key end

     0   :  { %v960_v0 = vmov 0.0   ;;  %vm961_vm0 = vmmov 0   ;;  %vm475_vm3 = vcmask 1044480   ;;  %vm669_vm6 = vcmask 1040384   ;;  %s1296_s2 = inlined_call_operand.vmem [shape: bf16[384,128], index: 2, kind: input, shape index: {}]   ;;  %s1297_s0 = inlined_call_operand.vmem [shape: f32[2,5,384], index: 0, kind: input, shape index: {}]   ;;  %s1298_s1 = inlined_call_operand.vmem [shape: f32[2,5,384], index: 1, kind: input, shape index: {}]   ;;  %s1299_s3 = inlined_call_operand.vmem [shape: f32[1,2,128], index: 3, kind: output, shape index: {}]  }
   0x1   :  { %838 = vmatprep.subr.bf16.mxu1 %v960_v0  ;;  %v986_v1 = vld [vmem:[%s1296_s2 + $0x40] sm:$0xff]   ;;  %854 = vmatprep.mubr.msk.bf16.mxu1 %vm961_vm0, %v960_v0  ;;  %v1005_v4 = vld [vmem:[%s1296_s2 + $0x48] sm:$0xff]   ;;  %v1023_v7 = vld [vmem:[%s1296_s2 + $0x50] sm:$0xff]   ;;  %79 = vst [vmem:[%s1299_s3] sm:$0x3] %v960_v0 }
   0x2   :  { %v993_v2 = vld [vmem:[%s1296_s2 + $0x80] sm:$0xff]   ;;  %714 = vmatprep.subr.bf16.mxu0 %v986_v1  ;;  %v1012_v5 = vld [vmem:[%s1296_s2 + $0x88] sm:$0xff]   ;;  %v1029_v8 = vld [vmem:[%s1296_s2 + $0x90] sm:$0xff]  }
   0x3   :  { %v999_v3 = vld [vmem:[%s1296_s2] sm:$0xff]   ;;  %839 = vmatpush3.bf16.msra.mxu1 %v993_v2  ;;  %v1018_v6 = vld [vmem:[%s1296_s2 + $0x8] sm:$0xff]   ;;  %v1036_v9 = vld [vmem:[%s1296_s2 + $0x10] sm:$0xff]  }
   0x4   :  { %715 = vmatpush3.bf16.msra.mxu0 %v999_v3  ;;  %840 = vmatprep.subr.bf16.mxu1 %v960_v0  ;;  %v1042_v10 = vld [vmem:[%s1296_s2 + $0x58] sm:$0xff]   ;;  %v1061_v13 = vld [vmem:[%s1296_s2 + $0x60] sm:$0xff]   ;;  %v1080_v16 = vld [vmem:[%s1296_s2 + $0x68] sm:$0xff]  }
   0x5   :  { %716 = vmatprep.subr.bf16.mxu0 %v1005_v4  ;;  %v1048_v11 = vld [vmem:[%s1296_s2 + $0x98] sm:$0xff]   ;;  %v1067_v14 = vld [vmem:[%s1296_s2 + $0xa0] sm:$0xff]   ;;  %v1085_v17 = vld [vmem:[%s1296_s2 + $0xa8] sm:$0xff]  }
   0x6   :  { %v1055_v12 = vld [vmem:[%s1296_s2 + $0x18] sm:$0xff]   ;;  %v1074_v15 = vld [vmem:[%s1296_s2 + $0x20] sm:$0xff]   ;;  %v1091_v18 = vld [vmem:[%s1296_s2 + $0x28] sm:$0xff]  }
   0x7   :  { %841 = vmatpush3.bf16.msra.mxu1 %v1012_v5  ;;  %v1098_v19 = vld [vmem:[%s1296_s2 + $0x70] sm:$0xff]   ;;  %v1115_v22 = vld [vmem:[%s1296_s2 + $0x78] sm:$0xff]   ;;  %v81_v23 = vld [vmem:[%s1297_s0 + $0x8] sm:$0x1f] }
   0x8   :  { %717 = vmatpush3.bf16.msra.mxu0 %v1018_v6  ;;  %842 = vmatprep.subr.bf16.mxu1 %v960_v0  ;;  %v1104_v20 = vld [vmem:[%s1296_s2 + $0xb0] sm:$0xff]   ;;  %v87_v24 = vld [vmem:[%s1298_s1 + $0x8] sm:$0x1f]  ;;  %v80_v25 = vld [vmem:[%s1297_s0] sm:$0x1f] }
   0x9   :  { %718 = vmatprep.subr.bf16.mxu0 %v1023_v7  ;;  %v1109_v21 = vld [vmem:[%s1296_s2 + $0x30] sm:$0xff]   ;;  %v93_v26 = vsub.f32 %v81_v23, %v87_v24  ;;  %v86_v27 = vld [vmem:[%s1298_s1] sm:$0x1f]  ;;  %v1141_v30 = vld [vmem:[%s1296_s2 + $0xb8] sm:$0xff]  }
   0xa   :  { %v82_v28 = vld [vmem:[%s1297_s0 + $0x10] sm:$0x1f]  ;;  %v92_v31 = vsub.f32 %v80_v25, %v86_v27  ;;  %v83_v33 = vld [vmem:[%s1297_s0 + $0x18] sm:$0x1f]  ;;  %v85_v36 = vld [vmem:[%s1297_s0 + $0x28] sm:$0x1f] }
   0xb   :  { %843 = vmatpush3.bf16.msra.mxu1 %v1029_v8  ;;  %v88_v29 = vld [vmem:[%s1298_s1 + $0x10] sm:$0x1f]  ;;  %v99_v34 = vmul.f32 %v93_v26, %v93_v26  ;;  %v89_v35 = vld [vmem:[%s1298_s1 + $0x18] sm:$0x1f]  ;;  %v91_v37 = vld [vmem:[%s1298_s1 + $0x28] sm:$0x1f] }
   0xc   :  { %719 = vmatpush3.bf16.msra.mxu0 %v1036_v9  ;;  %844 = vmatprep.subr.bf16.mxu1 %v960_v0  ;;  %v94_v32 = vsub.f32 %v82_v28, %v88_v29  ;;  %v1161_v38 = vld [vmem:[%s1296_s2 + $0x38] sm:$0xff]   ;;  %v98_v39 = vmul.f32 %v92_v31, %v92_v31  ;;  %v1163_v41 = vsub.f32 %v83_v33, %v89_v35  ;;  %v84_v55 = vld [vmem:[%s1297_s0 + $0x20] sm:$0x1f] }
   0xd   :  { %720 = vmatprep.subr.bf16.mxu0 %v1042_v10  ;;  %v153_v42 = vpack.c.bf16 %v99_v34, %v99_v34  ;;  %v1166_v43 = vsub.f32 %v85_v36, %v91_v37  ;;  %v90_v56 = vld [vmem:[%s1298_s1 + $0x20] sm:$0x1f] }
   0xe   :  { %v100_v40 = vmul.f32 %v94_v32, %v94_v32  ;;  %v152_v44 = vpack.c.bf16 %v98_v39, %v98_v39  ;;  %v96_v57 = vsub.f32 %v84_v55, %v90_v56  ;;  %v101_v63 = vmul.f32 %v1163_v41, %v1163_v41 }
   0xf   :  { %845 = vmatpush3.bf16.msra.mxu1 %v1048_v11  ;;  %v156_v46 = vunpack.c.l.bf16 %v153_v42  ;;  %v103_v23 = vmul.f32 %v1166_v43, %v1166_v43 }
  0x10   :  { %721 = vmatpush3.bf16.msra.mxu0 %v1055_v12  ;;  %846 = vmatprep.subr.bf16.mxu1 %v960_v0  ;;  %v154_v45 = vpack.c.bf16 %v100_v40, %v100_v40  ;;  %v155_v47 = vunpack.c.l.bf16 %v152_v44  ;;  %v102_v58 = vmul.f32 %v96_v57, %v96_v57  ;;  %v483_v24 = vpack.c.bf16 %v101_v63, %v101_v63 }
  0x11   :  { %722 = vmatprep.subr.bf16.mxu0 %v1061_v13  ;;  %v159_v49 = vsub.f32 %v99_v34, %v156_v46  ;;  %v485_v25 = vpack.c.bf16 %v103_v23, %v103_v23 }
  0x12   :  { %v157_v48 = vunpack.c.l.bf16 %v154_v45  ;;  %v158_v50 = vsub.f32 %v98_v39, %v155_v47  ;;  %v1200_v59 = vpack.c.bf16 %v102_v58, %v102_v58  ;;  %v486_v26 = vunpack.c.l.bf16 %v483_v24 }
  0x13   :  { %847 = vmatpush3.bf16.msra.mxu1 %v1067_v14  ;;  %v162_v52 = vpack.c.bf16 %v159_v49, %v159_v49  ;;  %v488_v27 = vunpack.c.l.bf16 %v485_v25 }
  0x14   :  { %723 = vmatpush3.bf16.msra.mxu0 %v1074_v15  ;;  %848 = vmatprep.subr.bf16.mxu1 %v960_v0  ;;  %v160_v51 = vsub.f32 %v100_v40, %v157_v48  ;;  %v161_v53 = vpack.c.bf16 %v158_v50, %v158_v50  ;;  %v487_v60 = vunpack.c.l.bf16 %v1200_v59  ;;  %v489_v28 = vsub.f32 %v101_v63, %v486_v26 }
  0x15   :  { %724 = vmatprep.subr.bf16.mxu0 %v1080_v16  ;;  %340 = vmatprep.mubr.bf16.mxu0 %v162_v52  ;;  %v491_v29 = vsub.f32 %v103_v23, %v488_v27 }
  0x16   :  { %v163_v54 = vpack.c.bf16 %v160_v51, %v160_v51  ;;  %v490_v61 = vsub.f32 %v102_v58, %v487_v60  ;;  %v492_v31 = vpack.c.bf16 %v489_v28, %v489_v28 }
  0x17   :  { %849 = vmatpush3.bf16.msra.mxu1 %v1085_v17  ;;  %v494_v32 = vpack.c.bf16 %v491_v29, %v491_v29 }
  0x18   :  { %725 = vmatpush3.bf16.msra.mxu0 %v1091_v18  ;;  %850 = vmatprep.subr.bf16.mxu1 %v960_v0  ;;  %v493_v62 = vpack.c.bf16 %v490_v61, %v490_v61 }
  0x19   :  { %726 = vmatprep.subr.bf16.mxu0 %v1098_v19 }
  0x1b   :  { %851 = vmatpush3.bf16.msra.mxu1 %v1104_v20 }
  0x1c   :  { %727 = vmatpush3.bf16.msra.mxu0 %v1109_v21  ;;  %852 = vmatprep.subr.bf16.mxu1 %v960_v0 }
  0x1d   :  { %728 = vmatprep.subr.bf16.mxu0 %v1115_v22 }
  0x1f   :  { %853 = vmatpush3.bf16.msra.mxu1 %v1141_v30 }
  0x20   :  { %729 = vmatpush3.bf16.msra.mxu0 %v1161_v38  ;;  %858 = vmatprep.subr.bf16.mxu1 %v960_v0 }
  0x21   :  { %745 = vmatprep.subr.bf16.mxu0 %v986_v1 }
  0x22   :  { %855 = vmatmul.mubr.bf16.vlgmr.msra.gmra.mrb[0].mxu1 %v163_v54 }
  0x23   :  { %341 = vmatmul.mubr.bf16.vlgmr.msra.gmra.mrb[0].mxu0 %v161_v53  ;;  %859 = vmatpush3.bf16.msra.mxu1 %v993_v2 }
  0x24   :  { %746 = vmatpush3.bf16.msra.mxu0 %v999_v3  ;;  %860 = vmatprep.subr.bf16.mxu1 %v960_v0 }
  0x25   :  { %747 = vmatprep.subr.bf16.mxu0 %v1005_v4  ;;  %874 = vmatprep.mubr.msk.bf16.mxu1 %vm961_vm0, %v960_v0 }
  0x26   :  { %420 = vmatprep.mubr.bf16.mxu0 %v153_v42 }
  0x27   :  { %861 = vmatpush3.bf16.msra.mxu1 %v1012_v5 }
  0x28   :  { %748 = vmatpush3.bf16.msra.mxu0 %v1018_v6  ;;  %862 = vmatprep.subr.bf16.mxu1 %v960_v0 }
  0x29   :  { %749 = vmatprep.subr.bf16.mxu0 %v1023_v7 }
  0x2b   :  { %863 = vmatpush3.bf16.msra.mxu1 %v1029_v8 }
  0x2c   :  { %750 = vmatpush3.bf16.msra.mxu0 %v1036_v9  ;;  %864 = vmatprep.subr.bf16.mxu1 %v960_v0 }
  0x2d   :  { %751 = vmatprep.subr.bf16.mxu0 %v1042_v10 }
  0x2f   :  { %865 = vmatpush3.bf16.msra.mxu1 %v1048_v11 }
  0x30   :  { %752 = vmatpush3.bf16.msra.mxu0 %v1055_v12  ;;  %866 = vmatprep.subr.bf16.mxu1 %v960_v0 }
  0x31   :  { %753 = vmatprep.subr.bf16.mxu0 %v1061_v13 }
  0x33   :  { %867 = vmatpush3.bf16.msra.mxu1 %v1067_v14 }
  0x34   :  { %754 = vmatpush3.bf16.msra.mxu0 %v1074_v15  ;;  %868 = vmatprep.subr.bf16.mxu1 %v960_v0 }
  0x35   :  { %755 = vmatprep.subr.bf16.mxu0 %v1080_v16 }
  0x37   :  { %869 = vmatpush3.bf16.msra.mxu1 %v1085_v17 }
  0x38   :  { %756 = vmatpush3.bf16.msra.mxu0 %v1091_v18  ;;  %870 = vmatprep.subr.bf16.mxu1 %v960_v0 }
  0x39   :  { %757 = vmatprep.subr.bf16.mxu0 %v1098_v19 }
  0x3b   :  { %871 = vmatpush3.bf16.msra.mxu1 %v1104_v20 }
  0x3c   :  { %758 = vmatpush3.bf16.msra.mxu0 %v1109_v21  ;;  %872 = vmatprep.subr.bf16.mxu1 %v960_v0 }
  0x3d   :  { %759 = vmatprep.subr.bf16.mxu0 %v1115_v22 }
  0x3f   :  { %873 = vmatpush3.bf16.msra.mxu1 %v1141_v30 }
  0x40   :  { %760 = vmatpush3.bf16.msra.mxu0 %v1161_v38  ;;  %878 = vmatprep.subr.bf16.mxu1 %v960_v0 }
  0x41   :  { %776 = vmatprep.subr.bf16.mxu0 %v986_v1 }
  0x42   :  { %875 = vmatmul.mubr.bf16.vlgmr.msra.gmra.mrb[0].mxu1 %v154_v45 }
  0x43   :  { %421 = vmatmul.mubr.bf16.vlgmr.msra.gmra.mrb[4].mxu0 %v152_v44  ;;  %879 = vmatpush3.bf16.msra.mxu1 %v993_v2 }
  0x44   :  { %777 = vmatpush3.bf16.msra.mxu0 %v999_v3  ;;  %880 = vmatprep.subr.bf16.mxu1 %v960_v0 }
  0x45   :  { %778 = vmatprep.subr.bf16.mxu0 %v1005_v4  ;;  %527 = vmatprep.mubr.bf16.mxu0 %v493_v62 }
  0x46   :  { %894 = vmatprep.mubr.msk.bf16.mxu1 %vm961_vm0, %v960_v0 }
  0x47   :  { %881 = vmatpush3.bf16.msra.mxu1 %v1012_v5 }
  0x48   :  { %779 = vmatpush3.bf16.msra.mxu0 %v1018_v6  ;;  %882 = vmatprep.subr.bf16.mxu1 %v960_v0 }
  0x49   :  { %780 = vmatprep.subr.bf16.mxu0 %v1023_v7 }
  0x4b   :  { %883 = vmatpush3.bf16.msra.mxu1 %v1029_v8 }
  0x4c   :  { %781 = vmatpush3.bf16.msra.mxu0 %v1036_v9  ;;  %884 = vmatprep.subr.bf16.mxu1 %v960_v0 }
  0x4d   :  { %782 = vmatprep.subr.bf16.mxu0 %v1042_v10 }
  0x4f   :  { %885 = vmatpush3.bf16.msra.mxu1 %v1048_v11 }
  0x50   :  { %783 = vmatpush3.bf16.msra.mxu0 %v1055_v12  ;;  %886 = vmatprep.subr.bf16.mxu1 %v960_v0 }
  0x51   :  { %784 = vmatprep.subr.bf16.mxu0 %v1061_v13 }
  0x53   :  { %887 = vmatpush3.bf16.msra.mxu1 %v1067_v14 }
  0x54   :  { %785 = vmatpush3.bf16.msra.mxu0 %v1074_v15  ;;  %888 = vmatprep.subr.bf16.mxu1 %v960_v0 }
  0x55   :  { %786 = vmatprep.subr.bf16.mxu0 %v1080_v16 }
  0x57   :  { %889 = vmatpush3.bf16.msra.mxu1 %v1085_v17 }
  0x58   :  { %787 = vmatpush3.bf16.msra.mxu0 %v1091_v18  ;;  %890 = vmatprep.subr.bf16.mxu1 %v960_v0 }
  0x59   :  { %788 = vmatprep.subr.bf16.mxu0 %v1098_v19 }
  0x5b   :  { %891 = vmatpush3.bf16.msra.mxu1 %v1104_v20 }
  0x5c   :  { %789 = vmatpush3.bf16.msra.mxu0 %v1109_v21  ;;  %892 = vmatprep.subr.bf16.mxu1 %v960_v0 }
  0x5d   :  { %790 = vmatprep.subr.bf16.mxu0 %v1115_v22 }
  0x5f   :  { %893 = vmatpush3.bf16.msra.mxu1 %v1141_v30 }
  0x60   :  { %791 = vmatpush3.bf16.msra.mxu0 %v1161_v38  ;;  %898 = vmatprep.subr.bf16.mxu1 %v960_v0 }
  0x61   :  { %807 = vmatprep.subr.bf16.mxu0 %v986_v1 }
  0x62   :  { %895 = vmatmul.mubr.bf16.vlgmr.msra.gmra.mrb[4].mxu1 %v494_v32 }
  0x63   :  { %528 = vmatmul.mubr.bf16.vlgmr.msra.gmra.mrb[8].mxu0 %v492_v31  ;;  %899 = vmatpush3.bf16.msra.mxu1 %v993_v2 }
  0x64   :  { %808 = vmatpush3.bf16.msra.mxu0 %v999_v3  ;;  %900 = vmatprep.subr.bf16.mxu1 %v960_v0 }
  0x65   :  { %809 = vmatprep.subr.bf16.mxu0 %v1005_v4  ;;  %914 = vmatprep.mubr.msk.bf16.mxu1 %vm961_vm0, %v960_v0 }
  0x66   :  { %607 = vmatprep.mubr.bf16.mxu0 %v1200_v59 }
  0x67   :  { %901 = vmatpush3.bf16.msra.mxu1 %v1012_v5 }
  0x68   :  { %810 = vmatpush3.bf16.msra.mxu0 %v1018_v6  ;;  %902 = vmatprep.subr.bf16.mxu1 %v960_v0 }
  0x69   :  { %811 = vmatprep.subr.bf16.mxu0 %v1023_v7 }
  0x6b   :  { %903 = vmatpush3.bf16.msra.mxu1 %v1029_v8 }
  0x6c   :  { %812 = vmatpush3.bf16.msra.mxu0 %v1036_v9  ;;  %904 = vmatprep.subr.bf16.mxu1 %v960_v0 }
  0x6d   :  { %813 = vmatprep.subr.bf16.mxu0 %v1042_v10 }
  0x6f   :  { %905 = vmatpush3.bf16.msra.mxu1 %v1048_v11 }
  0x70   :  { %814 = vmatpush3.bf16.msra.mxu0 %v1055_v12  ;;  %906 = vmatprep.subr.bf16.mxu1 %v960_v0 }
  0x71   :  { %815 = vmatprep.subr.bf16.mxu0 %v1061_v13 }
  0x73   :  { %907 = vmatpush3.bf16.msra.mxu1 %v1067_v14 }
  0x74   :  { %816 = vmatpush3.bf16.msra.mxu0 %v1074_v15  ;;  %908 = vmatprep.subr.bf16.mxu1 %v960_v0 }
  0x75   :  { %817 = vmatprep.subr.bf16.mxu0 %v1080_v16 }
  0x77   :  { %909 = vmatpush3.bf16.msra.mxu1 %v1085_v17 }
  0x78   :  { %818 = vmatpush3.bf16.msra.mxu0 %v1091_v18  ;;  %910 = vmatprep.subr.bf16.mxu1 %v960_v0 }
  0x79   :  { %819 = vmatprep.subr.bf16.mxu0 %v1098_v19 }
  0x7b   :  { %911 = vmatpush3.bf16.msra.mxu1 %v1104_v20 }
  0x7c   :  { %820 = vmatpush3.bf16.msra.mxu0 %v1109_v21  ;;  %912 = vmatprep.subr.bf16.mxu1 %v960_v0 }
  0x7d   :  { %821 = vmatprep.subr.bf16.mxu0 %v1115_v22 }
  0x7f   :  { %913 = vmatpush3.bf16.msra.mxu1 %v1141_v30 }
  0x80   :  { %822 = vmatpush3.bf16.msra.mxu0 %v1161_v38 }
  0x82   :  { %915 = vmatmul.mubr.bf16.vlgmr.msra.gmra.mrb[4].mxu1 %v485_v25 }
  0x83   :  { %608 = vmatmul.mubr.bf16.vlgmr.msra.gmra.mrb[12].mxu0 %v483_v24  ;;  %v671_v24 = vld [vmem:[%s1299_s3] sm:$0x3] }
  0xf6   :  { %v730_v1 = vpop.f32.mrb[0].mxu0 }
  0xf7   :  { %v731_v2 = vpop.f32.mrb[1].mxu0 }
  0xf8   :  { %v732_v3 = vadd.f32 %v731_v2, %v730_v1  ;;  %v733_v4 = vpop.f32.mrb[2].mxu0 }
  0xf9   :  { %v734_v5 = vpop.f32.mrb[3].mxu0 }
 0x115   :  { %v462_v6 = vpop.f32.mrb[0].mxu1 }
 0x116   :  { %v761_v7 = vpop.f32.mrb[4].mxu0  ;;  %v876_v8 = vpop.f32.mrb[1].mxu1 }
 0x117   :  { %v762_v9 = vpop.f32.mrb[5].mxu0  ;;  %v465_v11 = vpop.f32.mrb[2].mxu1 }
 0x118   :  { %v763_v10 = vadd.f32 %v762_v9, %v761_v7  ;;  %v764_v12 = vpop.f32.mrb[6].mxu0  ;;  %v877_v13 = vpop.f32.mrb[3].mxu1 }
 0x119   :  { %v765_v14 = vpop.f32.mrb[7].mxu0 }
 0x11a   :  { %v918_v15 = vadd.f32 %v763_v10, %v732_v3 }
 0x11c   :  { %v919_v16 = vadd.f32 %v918_v15, %v462_v6 }
 0x11e   :  { %956 = vrsqrt.f32 %v919_v16  ;;  %vm470_vm1 = vcmp.eq.f32.partialorder %v919_v16, inf  ;;  %v473_v43 = vand.u32 2147483648, %v919_v16  ;;  %vm472_vm2 = vcmp.eq.f32.partialorder %v919_v16, 0.0 }
 0x128   :  { %v957_v21 = vpop.eup %956 }
 0x129   :  { %v469_v33 = vmul.f32 %v957_v21, %v919_v16 }
 0x12b   :  { %v471_v42 = vsel %vm470_vm1, %v919_v16, %v469_v33 }
 0x12c   :  { %v474_v45 = vsel %vm472_vm2, %v473_v43, %v471_v42 }
 0x12d   :  { %v476_v46 = vsel %vm475_vm3, %v474_v45, 0.0 }
 0x12e   :  { %v477_v47 = vrot.slane %v476_v46, 4 }
 0x130   :  { %v478_v49 = vadd.f32 %v477_v47, %v476_v46 }
 0x132   :  { %v479_v53 = vrot.slane %v478_v49, 2 }
 0x134   :  { %v480_v57 = vadd.f32 %v479_v53, %v478_v49 }
 0x136   :  { %v792_v17 = vpop.f32.mrb[8].mxu0  ;;  %v481_v60 = vrot.slane %v480_v57, 1 }
 0x137   :  { %v793_v18 = vpop.f32.mrb[9].mxu0 }
 0x138   :  { %v794_v19 = vadd.f32 %v793_v18, %v792_v17  ;;  %v795_v0 = vpop.f32.mrb[10].mxu0  ;;  %v482_v63 = vadd.f32 %v481_v60, %v480_v57 }
 0x139   :  { %v796_v20 = vpop.f32.mrb[11].mxu0 }
 0x155   :  { %v649_v22 = vpop.f32.mrb[4].mxu1 }
 0x156   :  { %v823_v30 = vpop.f32.mrb[12].mxu0  ;;  %v916_v34 = vpop.f32.mrb[5].mxu1 }
 0x157   :  { %v824_v35 = vpop.f32.mrb[13].mxu0  ;;  %v652_v37 = vpop.f32.mrb[6].mxu1 }
 0x158   :  { %v825_v36 = vadd.f32 %v824_v35, %v823_v30  ;;  %v826_v38 = vpop.f32.mrb[14].mxu0  ;;  %v917_v39 = vpop.f32.mrb[7].mxu1 }
 0x159   :  { %v827_v40 = vpop.f32.mrb[15].mxu0 }
 0x15a   :  { %v920_v41 = vadd.f32 %v825_v36, %v794_v19 }
 0x15c   :  { %v921_v44 = vadd.f32 %v920_v41, %v649_v22 }
 0x15e   :  { %958 = vrsqrt.f32 %v921_v44  ;;  %vm657_vm4 = vcmp.eq.f32.partialorder %v921_v44, inf  ;;  %v660_v51 = vand.u32 2147483648, %v921_v44  ;;  %vm659_vm5 = vcmp.eq.f32.partialorder %v921_v44, 0.0 }
 0x168   :  { %v959_v48 = vpop.eup %958 }
 0x169   :  { %v656_v50 = vmul.f32 %v959_v48, %v921_v44 }
 0x16b   :  { %v658_v52 = vsel %vm657_vm4, %v921_v44, %v656_v50 }
 0x16c   :  { %v661_v54 = vsel %vm659_vm5, %v660_v51, %v658_v52 }
 0x16d   :  { %v662_v55 = vsel %vm475_vm3, %v661_v54, 0.0 }
 0x16e   :  { %v663_v56 = vrot.slane %v662_v55, 4 }
 0x170   :  { %v664_v58 = vadd.f32 %v663_v56, %v662_v55 }
 0x172   :  { %v665_v59 = vrot.slane %v664_v58, 2 }
 0x174   :  { %v666_v61 = vadd.f32 %v665_v59, %v664_v58 }
 0x176   :  { %v667_v62 = vrot.slane %v666_v61, 1 }
 0x178   :  { %v668_v23 = vadd.f32 %v667_v62, %v666_v61 }
 0x17a   :  { %v670_v25 = vsel %vm669_vm6, %v482_v63, %v668_v23 }
 0x17b   :  { %v672_v26 = vadd.f32 %v671_v24, %v670_v25 }
 0x17d   :  { %673 = vst [vmem:[%s1299_s3] sm:$0x3] %v672_v26 }

</bundles_post_ra>
